<compile_context>
chip_gen: v6e
topology: v6e:2x2x1
jax: 0.10.0
libtpu: 0.0.40
codegen_flags: <defaults>
</compile_context>

<pallas_src>
import functools

import jax
import jax.numpy as jnp
from jax.experimental import pallas as pl
from jax.experimental.pallas import tpu as pltpu

LN_EPS = 1e-5  # matches torch.nn.LayerNorm default


# --------------------------------------------------------------------------
# Kernel bodies
# --------------------------------------------------------------------------
def _ln_add_kernel(x_ref, res_ref, g_ref, b_ref, o_ref):
    """Eval mode: LayerNorm over last dim -> residual add (dropout = identity)."""
    x = x_ref[...].astype(jnp.float32)                       # (rb, H)
    h = x.shape[-1]
    # Fused single-pass statistics: mean and E[x^2]  (one reduction sweep less).
    s1 = jnp.sum(x, axis=-1, keepdims=True)
    s2 = jnp.sum(x * x, axis=-1, keepdims=True)
    mean = s1 * (1.0 / h)
    var = jnp.maximum(s2 * (1.0 / h) - mean * mean, 0.0)
    inv = jax.lax.rsqrt(var + LN_EPS)
    y = (x - mean) * inv
    y = y * g_ref[...].astype(jnp.float32) + b_ref[...].astype(jnp.float32)
    o_ref[...] = (y + res_ref[...].astype(jnp.float32)).astype(o_ref.dtype)


def _make_ln_drop_add_kernel(dropout_p: float):
    """Training mode: LayerNorm -> inverted dropout (integer threshold) -> add."""
    keep_scale = 1.0 / (1.0 - dropout_p)
    # P(bits < thresh) == dropout_p for uniform uint32 bits.
    thresh = min(int(round(dropout_p * 4294967296.0)), 4294967295)

    def kernel(x_ref, res_ref, g_ref, b_ref, bits_ref, o_ref):
        x = x_ref[...].astype(jnp.float32)                    # (rb, H)
        h = x.shape[-1]
        s1 = jnp.sum(x, axis=-1, keepdims=True)
        s2 = jnp.sum(x * x, axis=-1, keepdims=True)
        mean = s1 * (1.0 / h)
        var = jnp.maximum(s2 * (1.0 / h) - mean * mean, 0.0)
        inv = jax.lax.rsqrt(var + LN_EPS)
        y = (x - mean) * inv
        y = y * g_ref[...].astype(jnp.float32) + b_ref[...].astype(jnp.float32)
        keep = bits_ref[...] >= jnp.uint32(thresh)            # integer compare only
        y = jnp.where(keep, y * keep_scale, 0.0)
        o_ref[...] = (y + res_ref[...].astype(jnp.float32)).astype(o_ref.dtype)

    return kernel


# --------------------------------------------------------------------------
# Wrapper
# --------------------------------------------------------------------------
@functools.partial(
    jax.jit, static_argnames=("dropout_p", "training", "row_block")
)
def pre_post_processing_nda(
    tensor,
    input_tensor,
    gamma,
    beta,
    dropout_bits=None,
    *,
    dropout_p: float = 0.1,
    training: bool = False,
    row_block: int = 512,
):
    """Fused 'nda' PrePostProcessing forward.

    tensor, input_tensor: [T, B, H]
    gamma, beta:          [H]                 (LayerNorm affine params)
    dropout_bits:         uint32 [T, B, H]    (required iff training and p>0)
    """
    T, B, H = tensor.shape
    rows = T * B
    apply_dropout = bool(training) and dropout_p > 0.0
    if apply_dropout and dropout_bits is None:
        raise ValueError("dropout_bits required when training with dropout_p > 0")

    x2 = tensor.reshape(rows, H)
    r2 = input_tensor.reshape(rows, H)
    g2 = gamma.reshape(1, H)
    b2 = beta.reshape(1, H)
    bits2 = dropout_bits.reshape(rows, H) if apply_dropout else None

    # ---- choose row tile -------------------------------------------------
    itemsize = jnp.dtype(tensor.dtype).itemsize
    sublane = {4: 8, 2: 16, 1: 32}.get(itemsize, 8)   # keep packed sublanes full
    rb = min(int(row_block), rows)
    if rb >= sublane:
        rb = (rb // sublane) * sublane

    # Conservative VMEM budget (fits v7x's 64 MiB/TC with headroom); shrink the
    # tile until double-buffered I/O + f32 intermediates fit.
    def _tile_bytes(rb_):
        io = 3 * rb_ * H * itemsize                   # x, residual, out
        bits = rb_ * H * 4 if apply_dropout else 0    # uint32 dropout bits
        temps = 4 * rb_ * H * 4                       # f32 intermediates headroom
        return 2 * (io + bits) + temps                # 2x for double-buffering

    VMEM_BUDGET = 40 * 1024 * 1024
    while rb > sublane and _tile_bytes(rb) > VMEM_BUDGET:
        rb = max(sublane, ((rb // 2) // sublane) * sublane)

    # ---- pad rows so the tile always divides (pad rows are sliced away) ---
    pad = (-rows) % rb
    if pad:
        x2 = jnp.pad(x2, ((0, pad), (0, 0)))
        r2 = jnp.pad(r2, ((0, pad), (0, 0)))
        if apply_dropout:
            bits2 = jnp.pad(bits2, ((0, pad), (0, 0)))
    rows_p = rows + pad
    grid = (rows_p // rb,)

    vmem_limit = int(min(max(_tile_bytes(rb), 32 * 1024 * 1024),
                         48 * 1024 * 1024))

    in_specs = [
        pl.BlockSpec((rb, H), lambda i: (i, 0)),      # x
        pl.BlockSpec((rb, H), lambda i: (i, 0)),      # residual
        pl.BlockSpec((1, H), lambda i: (0, 0)),       # gamma
        pl.BlockSpec((1, H), lambda i: (0, 0)),       # beta
    ]
    args = [x2, r2, g2, b2]
    if apply_dropout:
        in_specs.append(pl.BlockSpec((rb, H), lambda i: (i, 0)))  # dropout bits
        args.append(bits2)
        kernel = _make_ln_drop_add_kernel(float(dropout_p))
    else:
        kernel = _ln_add_kernel

    out2 = pl.pallas_call(
        kernel,
        out_shape=jax.ShapeDtypeStruct((rows_p, H), tensor.dtype),
        grid=grid,
        in_specs=in_specs,
        out_specs=pl.BlockSpec((rb, H), lambda i: (i, 0)),
        compiler_params=pltpu.CompilerParams(
            dimension_semantics=("parallel",),        # rows fully independent
            vmem_limit_bytes=vmem_limit,
        ),
    )(*args)

    if pad:
        out2 = out2[:rows]
    return out2.reshape(T, B, H)


# --------------------------------------------------------------------------
# Pure-JAX reference (same dropout-bit convention as the kernel)
# --------------------------------------------------------------------------
def _reference_nda(tensor, input_tensor, gamma, beta, bits=None, dropout_p=0.0):
    x = tensor.astype(jnp.float32)
    mean = jnp.mean(x, axis=-1, keepdims=True)
    var = jnp.mean((x - mean) ** 2, axis=-1, keepdims=True)
    y = (x - mean) * jax.lax.rsqrt(var + LN_EPS)
    y = y * gamma.astype(jnp.float32) + beta.astype(jnp.float32)
    if bits is not None and dropout_p > 0.0:
        thresh = min(int(round(dropout_p * 4294967296.0)), 4294967295)
        keep = bits >= jnp.uint32(thresh)
        y = jnp.where(keep, y / (1.0 - dropout_p), 0.0)
    return (y + input_tensor.astype(jnp.float32)).astype(tensor.dtype)


if __name__ == "__main__":
    # Small, module-consistent shapes: seq T=8, batch B=2, d_model H=128.
    T, B, H = 8, 2, 128
    dropout_p = 0.1

    key = jax.random.PRNGKey(0)
    k1, k2, k3, k4, k5 = jax.random.split(key, 5)

    tensor = jax.random.normal(k1, (T, B, H), dtype=jnp.float32)
    residual = jax.random.normal(k2, (T, B, H), dtype=jnp.float32)
    gamma = 1.0 + 0.02 * jax.random.normal(k3, (H,), dtype=jnp.float32)
    beta = 0.02 * jax.random.normal(k4, (H,), dtype=jnp.float32)

    # ---- eval mode (dropout = identity) ----------------------------------
    out_eval = pre_post_processing_nda(
        tensor, residual, gamma, beta,
        dropout_p=dropout_p, training=False,
    )
    jax.block_until_ready(out_eval)
    ref_eval = _reference_nda(tensor, residual, gamma, beta)
    assert out_eval.shape == (T, B, H)
    assert jnp.allclose(out_eval, ref_eval, atol=1e-4, rtol=1e-4), "eval mismatch"

    # ---- training mode (dropout mask from host-generated uint32 bits) ----
    bits = jax.random.bits(k5, (T, B, H), dtype=jnp.uint32)
    out_train = pre_post_processing_nda(
        tensor, residual, gamma, beta, bits,
        dropout_p=dropout_p, training=True,
    )
    jax.block_until_ready(out_train)
    ref_train = _reference_nda(tensor, residual, gamma, beta,
                               bits=bits, dropout_p=dropout_p)
    assert out_train.shape == (T, B, H)
    assert jnp.allclose(out_train, ref_train, atol=1e-4, rtol=1e-4), "train mismatch"

    print("KERNEL_OK")
</pallas_src>

<mosaic_0001>
module attributes {stable_mosaic.version = 11 : i64} {
  func.func @_ln_add_kernel(%arg0: i32, %arg1: memref<16x128xf32, #tpu.memory_space<vmem>>, %arg2: memref<16x128xf32, #tpu.memory_space<vmem>>, %arg3: memref<1x128xf32, #tpu.memory_space<vmem>>, %arg4: memref<1x128xf32, #tpu.memory_space<vmem>>, %arg5: memref<16x128xf32, #tpu.memory_space<vmem>>) attributes {dimension_semantics = [#tpu.dimension_semantics<parallel>], iteration_bounds = array<i64: 1>, scalar_prefetch = 0 : i64, scratch_operands = 0 : i64, tpu.core_type = #tpu.core_type<tc>, window_params = [{transform_indices = @transform_0, window_bounds = array<i64: 16, 128>}, {transform_indices = @transform_1, window_bounds = array<i64: 16, 128>}, {pipeline_mode = #tpu.pipeline_mode<synchronous>, transform_indices = @transform_2, window_bounds = array<i64: 1, 128>}, {pipeline_mode = #tpu.pipeline_mode<synchronous>, transform_indices = @transform_3, window_bounds = array<i64: 1, 128>}, {transform_indices = @transform_4, window_bounds = array<i64: 16, 128>}]} {
    %c0 = arith.constant 0 : index
    %c0_0 = arith.constant 0 : index
    %0 = vector.load %arg1[%c0, %c0_0] : memref<16x128xf32, #tpu.memory_space<vmem>>, vector<16x128xf32>
    %cst = arith.constant dense<0.000000e+00> : vector<16xf32>
    %1 = vector.multi_reduction <add>, %0, %cst [1] : vector<16x128xf32> to vector<16xf32>
    %2 = vector.shape_cast %1 : vector<16xf32> to vector<16x1xf32>
    %3 = arith.mulf %0, %0 : vector<16x128xf32>
    %cst_1 = arith.constant dense<0.000000e+00> : vector<16xf32>
    %4 = vector.multi_reduction <add>, %3, %cst_1 [1] : vector<16x128xf32> to vector<16xf32>
    %5 = vector.shape_cast %4 : vector<16xf32> to vector<16x1xf32>
    %cst_2 = arith.constant 7.812500e-03 : f32
    %6 = vector.broadcast %cst_2 : f32 to vector<16x1xf32>
    %7 = arith.mulf %2, %6 : vector<16x1xf32>
    %cst_3 = arith.constant 7.812500e-03 : f32
    %8 = vector.broadcast %cst_3 : f32 to vector<16x1xf32>
    %9 = arith.mulf %5, %8 : vector<16x1xf32>
    %10 = arith.mulf %7, %7 : vector<16x1xf32>
    %11 = arith.subf %9, %10 : vector<16x1xf32>
    %cst_4 = arith.constant 0.000000e+00 : f32
    %12 = vector.broadcast %cst_4 : f32 to vector<16x1xf32>
    %13 = arith.maximumf %11, %12 : vector<16x1xf32>
    %cst_5 = arith.constant 9.99999974E-6 : f32
    %14 = vector.broadcast %cst_5 : f32 to vector<16x1xf32>
    %15 = arith.addf %13, %14 : vector<16x1xf32>
    %16 = math.rsqrt %15 : vector<16x1xf32>
    %17 = vector.broadcast %7 : vector<16x1xf32> to vector<16x128xf32>
    %18 = arith.subf %0, %17 : vector<16x128xf32>
    %19 = vector.broadcast %16 : vector<16x1xf32> to vector<16x128xf32>
    %20 = arith.mulf %18, %19 : vector<16x128xf32>
    %c0_6 = arith.constant 0 : index
    %c0_7 = arith.constant 0 : index
    %21 = vector.load %arg3[%c0_6, %c0_7] : memref<1x128xf32, #tpu.memory_space<vmem>>, vector<1x128xf32>
    %22 = vector.broadcast %21 : vector<1x128xf32> to vector<16x128xf32>
    %23 = arith.mulf %20, %22 : vector<16x128xf32>
    %c0_8 = arith.constant 0 : index
    %c0_9 = arith.constant 0 : index
    %24 = vector.load %arg4[%c0_8, %c0_9] : memref<1x128xf32, #tpu.memory_space<vmem>>, vector<1x128xf32>
    %25 = vector.broadcast %24 : vector<1x128xf32> to vector<16x128xf32>
    %26 = arith.addf %23, %25 : vector<16x128xf32>
    %c0_10 = arith.constant 0 : index
    %c0_11 = arith.constant 0 : index
    %27 = vector.load %arg2[%c0_10, %c0_11] : memref<16x128xf32, #tpu.memory_space<vmem>>, vector<16x128xf32>
    %28 = arith.addf %26, %27 : vector<16x128xf32>
    %c0_12 = arith.constant 0 : index
    %c0_13 = arith.constant 0 : index
    %29 = vector.load %arg5[%c0_12, %c0_13] : memref<16x128xf32, #tpu.memory_space<vmem>>, vector<16x128xf32>
    tpu.vector_store %arg5[%c0_12, %c0_13], %28 {strides = array<i32>} : memref<16x128xf32, #tpu.memory_space<vmem>>, vector<16x128xf32>,
    return
  }
  func.func @transform_0(%arg0: i32) -> (i32, i32) {
    %c0_i32 = arith.constant 0 : i32
    %c0_i32_0 = arith.constant 0 : i32
    return %arg0, %c0_i32 : i32, i32
  }
  func.func @transform_1(%arg0: i32) -> (i32, i32) {
    %c0_i32 = arith.constant 0 : i32
    %c0_i32_0 = arith.constant 0 : i32
    return %arg0, %c0_i32 : i32, i32
  }
  func.func @transform_2(%arg0: i32) -> (i32, i32) {
    %c0_i32 = arith.constant 0 : i32
    %c0_i32_0 = arith.constant 0 : i32
    %c0_i32_1 = arith.constant 0 : i32
    return %c0_i32, %c0_i32_0 : i32, i32
  }
  func.func @transform_3(%arg0: i32) -> (i32, i32) {
    %c0_i32 = arith.constant 0 : i32
    %c0_i32_0 = arith.constant 0 : i32
    %c0_i32_1 = arith.constant 0 : i32
    return %c0_i32, %c0_i32_0 : i32, i32
  }
  func.func @transform_4(%arg0: i32) -> (i32, i32) {
    %c0_i32 = arith.constant 0 : i32
    %c0_i32_0 = arith.constant 0 : i32
    return %arg0, %c0_i32 : i32, i32
  }
}

</mosaic_0001>

<bundles_post_ra>
// kernel: pre_post_processing_nda.1
= control target key start
LH: loop header
LB: loop body
LE: loop exit
PB: predicated region body
PF: predicated region fallthrough
CT: control target
= control target key end

     0   :  { %9 = vsyncpa [#allocation3], 0  ;;  %s249_s0 = inlined_call_operand.hbm [shape: f32[16,128], index: 0, kind: input, shape index: {}]   ;;  %s250_s1 = inlined_call_operand.hbm [shape: f32[16,128], index: 1, kind: input, shape index: {}]   ;;  %s251_s2 = inlined_call_operand.vmem [shape: f32[1,128], index: 2, kind: input, shape index: {}]   ;;  %s252_s3 = inlined_call_operand.vmem [shape: f32[1,128], index: 3, kind: input, shape index: {}]   ;;  %s253_s4 = inlined_call_operand.hbm [shape: f32[16,128], index: 4, kind: output, shape index: {}]  }
   0x1   :  { %10 = vsyncpa [#allocation6], 0 }
   0x2   :  { %11 = vsyncpa [#allocation4], 0  ;;  %s195_s15 = smov [#allocation2]  }
   0x3   :  { %s17_s16 = sshll.u32 %s195_s15, 4  ;;  %s18_s16 = int_to_ptr.vmem [resolvable:$true] %s17_s16 }
   0x4   :  { %s137_s17 = scalar_lea.vmem %s18_s16, 256  ;;  %p142_p1 = scmp.lt.s32.totalorder %s18_s16, %s18_s16 }
   0x5   :  { %p138_p0 = scmp.ne.s32.totalorder %s18_s16, %s137_s17  ;;  %p143_p2 = scmp.lt.s32.totalorder %s137_s17, %s137_s17 }
   0x7   :  { %p144_p3 = por %p143_p2, %p142_p1 }
   0x9   :  { %p145_p4 = pnand %p144_p3, %p138_p0 }
   0xb   :  { %148 = shalt.err (!%p145_p4)
}
   0xc   :  { %s196_s18 = smov 128   ;;  %s197_s19 = smov 8  }
   0xd   :  { %23 = dma.hbm_to_vmem [thread:$0]  %s249_s0, 256, %s18_s16, [#allocation3], %s196_s18, %s196_s18, %s197_s19  }
   0xe   :  { %s198_s22 = smov [#allocation5]  }
   0xf   :  { %s29_s23 = sshll.u32 %s198_s22, 4  ;;  %s30_s23 = int_to_ptr.vmem [resolvable:$true] %s29_s23 }
  0x10   :  { %s157_s24 = scalar_lea.vmem %s30_s23, 256  ;;  %p162_p6 = scmp.lt.s32.totalorder %s30_s23, %s30_s23 }
  0x11   :  { %p158_p5 = scmp.ne.s32.totalorder %s30_s23, %s157_s24  ;;  %p163_p7 = scmp.lt.s32.totalorder %s157_s24, %s157_s24 }
  0x13   :  { %p164_p8 = por %p163_p7, %p162_p6 }
  0x15   :  { %p165_p9 = pnand %p164_p8, %p158_p5 }
  0x17   :  { %168 = shalt.err (!%p165_p9)
}
  0x18   :  { %35 = dma.hbm_to_vmem [thread:$0]  %s250_s1, 256, %s30_s23, [#allocation6], %s196_s18, %s196_s18, %s197_s19  }
  0x19   :  { %189 = dma.done.wait [#allocation3], 256  }
  0x1a   :  { %190 = vsyncadd [#allocation3], 4294967040 }
  0x1b   :  { %191 = dma.done.wait [#allocation6], 256  }
  0x1c   :  { %192 = vsyncadd [#allocation6], 4294967040  ;;  %v46_v0 = vld [vmem:[#allocation2] sm:$0xff]  ;;  %v47_v1 = vld [vmem:[#allocation2 + $0x8] sm:$0xff]  ;;  %s199_s29 = smov [#allocation7]  }
  0x1d   :  { %48 = vadd.xlane.f32.xlu0 %v46_v0  ;;  %v52_v2 = vmul.f32 %v46_v0, %v46_v0  ;;  %v53_v3 = vmul.f32 %v47_v1, %v47_v1  ;;  %v118_v22 = vld [vmem:[%s251_s2] ss:$0 sm:$0xff]  ;;  %v94_v28 = vld [vmem:[#allocation5] sm:$0xff]  ;;  %v95_v33 = vld [vmem:[#allocation5 + $0x8] sm:$0xff]  ;;  %s105_s30 = sshll.u32 %s199_s29, 4  ;;  %s106_s30 = int_to_ptr.vmem [resolvable:$true] %s105_s30 }
  0x1e   :  { %v119_v24 = vld [vmem:[%s252_s3] ss:$0 sm:$0xff]  ;;  %s169_s2 = scalar_lea.vmem %s106_s30, 256  ;;  %p174_p11 = scmp.lt.s32.totalorder %s106_s30, %s106_s30 }
  0x1f   :  { %54 = vadd.xlane.f32.xlu1 %v52_v2  ;;  %p170_p10 = scmp.ne.s32.totalorder %s106_s30, %s169_s2  ;;  %p175_p12 = scmp.lt.s32.totalorder %s169_s2, %s169_s2 }
  0x21   :  { %50 = vadd.xlane.f32.xlu0 %v47_v1  ;;  %p176_p13 = por %p175_p12, %p174_p11 }
  0x23   :  { %56 = vadd.xlane.f32.xlu1 %v53_v3  ;;  %p177_p0 = pnand %p176_p13, %p170_p10 }
  0xa6   :  { %v49_v4 = vpop.xlane.xlu0 %48 }
  0xa7   :  { %v58_v5 = vmul.f32 0.0078125, %v49_v4 }
  0xa8   :  { %v55_v6 = vpop.xlane.xlu1 %54 }
  0xa9   :  { %v62_v7 = vmul.f32 %v58_v5, %v58_v5  ;;  %v60_v8 = vmul.f32 0.0078125, %v55_v6  ;;  %v72_v20 = vsub.f32 %v46_v0, %v58_v5 }
  0xaa   :  { %v51_v9 = vpop.xlane.xlu0 %50 }
  0xab   :  { %v64_v10 = vsub.f32 %v60_v8, %v62_v7  ;;  %v59_v11 = vmul.f32 0.0078125, %v51_v9 }
  0xac   :  { %v57_v12 = vpop.xlane.xlu1 %56 }
  0xad   :  { %v66_v13 = vmax.f32 %v64_v10, 0.0  ;;  %v63_v14 = vmul.f32 %v59_v11, %v59_v11  ;;  %v61_v15 = vmul.f32 0.0078125, %v57_v12  ;;  %v73_v25 = vsub.f32 %v47_v1, %v59_v11 }
  0xaf   :  { %v68_v16 = vadd.f32 1e-05, %v66_v13  ;;  %v65_v17 = vsub.f32 %v61_v15, %v63_v14 }
  0xb1   :  { %125 = vrsqrt.f32 %v68_v16  ;;  %v67_v18 = vmax.f32 %v65_v17, 0.0 }
  0xb3   :  { %v69_v19 = vadd.f32 1e-05, %v67_v18 }
  0xb5   :  { %127 = vrsqrt.f32 %v69_v19 }
  0xbe   :  { %v126_v21 = vpop.eup %125 }
  0xbf   :  { %v74_v23 = vmul.f32 %v126_v21, %v72_v20 }
  0xc1   :  { %v83_v26 = vmul.f32 %v118_v22, %v74_v23 }
  0xc2   :  { %v128_v27 = vpop.eup %127 }
  0xc3   :  { %v75_v29 = vmul.f32 %v128_v27, %v73_v25  ;;  %v92_v30 = vadd.f32 %v119_v24, %v83_v26 }
  0xc5   :  { %v84_v31 = vmul.f32 %v118_v22, %v75_v29  ;;  %v96_v32 = vadd.f32 %v94_v28, %v92_v30 }
  0xc7   :  { %v93_v34 = vadd.f32 %v119_v24, %v84_v31  ;;  %98 = vst [vmem:[#allocation7] sm:$0xff] %v96_v32 }
  0xc9   :  { %v97_v35 = vadd.f32 %v95_v33, %v93_v34 }
  0xcb   :  { %99 = vst [vmem:[#allocation7 + $0x8] sm:$0xff] %v97_v35 }
  0xcc   :  { %180 = shalt.err (!%p177_p0)
}
  0xcd   :  { %111 = dma.vmem_to_hbm [thread:$0]  %s106_s30, 256, %s253_s4, [#allocation4], %s196_s18, %s196_s18, %s197_s19  }
  0xce   :  { %193 = dma.done.wait [#allocation4], 256  }
  0xcf   :  { %194 = vsyncadd [#allocation4], 4294967040 }
  0xd0   :  { %115 = vsyncpa [#allocation3], 1 }
  0xd1   :  { %116 = vsyncpa [#allocation6], 1 }
  0xd2   :  { %117 = vsyncpa [#allocation4], 1 }

</bundles_post_ra>
